<compile_context>
chip_gen: v5e
topology: v5e:2x2
jax: 0.10.0
libtpu: 0.0.40
codegen_flags: <defaults>
</compile_context>

<pallas_src>
import functools

import jax
import jax.numpy as jnp
from jax import lax
from jax.experimental import pallas as pl
from jax.experimental.pallas import tpu as pltpu


def _round_up(x, m):
    return (x + m - 1) // m * m


def _flash_attn_kernel(q_ref, k_ref, v_ref, o_ref,
                       m_sc, l_sc, acc_sc,
                       *, kv_len, block_kv, need_mask):
    # grid = (batch, q_tile, kv_tile); kv is the innermost (reduction) axis.
    ki = pl.program_id(2)
    nk = pl.num_programs(2)

    @pl.when(ki == 0)
    def _init():
        m_sc[...] = jnp.full(m_sc.shape, -jnp.inf, dtype=jnp.float32)
        l_sc[...] = jnp.zeros(l_sc.shape, dtype=jnp.float32)
        acc_sc[...] = jnp.zeros(acc_sc.shape, dtype=jnp.float32)

    # Scores (tq, tk): contract over d_k of both operands -> no explicit k.T
    # (no XLU transpose).  MXU operands stay in the streamed dtype (bf16 when
    # the wrapper downcast them); accumulation is f32.
    s = lax.dot_general(q_ref[...], k_ref[...], (((1,), (1,)), ((), ())),
                        preferred_element_type=jnp.float32)

    if need_mask:
        # Zero-padded kv rows past the true sequence length get -inf scores.
        col = ki * block_kv + lax.broadcasted_iota(jnp.int32, s.shape, 1)
        s = jnp.where(col < kv_len, s, -jnp.inf)

    # TODO(synk): look_ahead_mask path (masked_fill with -inf on the score
    # tile) not wired in; the reference default call uses look_ahead_mask=None.

    # Online softmax (all elementwise math in f32).
    m_prev = m_sc[...]
    m_new = jnp.maximum(m_prev, jnp.max(s, axis=-1, keepdims=True))
    alpha = jnp.exp(m_prev - m_new)
    p = jnp.exp(s - m_new)
    l_sc[...] = alpha * l_sc[...] + jnp.sum(p, axis=-1, keepdims=True)
    acc_sc[...] = alpha * acc_sc[...] + jnp.dot(
        p.astype(v_ref.dtype), v_ref[...], preferred_element_type=jnp.float32)
    m_sc[...] = m_new

    @pl.when(ki == nk - 1)
    def _finalize():
        inv_l = pl.reciprocal(l_sc[...], approx=True)
        o_ref[...] = (acc_sc[...] * inv_l).astype(o_ref.dtype)


def _flash_attention(qp, kp, vp, *, out_dtype, block=256):
    """Flash attention over already-projected (and already-scaled-q) tensors.

    qp, kp: (b, n, d_k); vp: (b, n, d_v).  Returns (b, n, d_v) in out_dtype.
    """
    b, n, d_k = qp.shape
    d_v = vp.shape[-1]

    # One square tile size for both q and kv; pad the sequence so it divides.
    t = min(block, _round_up(n, 8))
    n_pad = _round_up(n, t)
    need_mask = n_pad != n
    if need_mask:
        pad = ((0, 0), (0, n_pad - n), (0, 0))
        qp = jnp.pad(qp, pad)
        kp = jnp.pad(kp, pad)
        vp = jnp.pad(vp, pad)

    grid = (b, n_pad // t, n_pad // t)

    itemsize = jnp.dtype(qp.dtype).itemsize
    out_itemsize = jnp.dtype(out_dtype).itemsize
    flops = 2 * b * n_pad * n_pad * (d_k + d_v)
    transcendentals = b * n_pad * n_pad
    bytes_accessed = ((qp.size + kp.size + vp.size) * itemsize
                      + b * n_pad * d_v * out_itemsize)

    kernel = functools.partial(_flash_attn_kernel,
                               kv_len=n, block_kv=t, need_mask=need_mask)

    out = pl.pallas_call(
        kernel,
        out_shape=jax.ShapeDtypeStruct((b, n_pad, d_v), out_dtype),
        grid_spec=pltpu.PrefetchScalarGridSpec(
            num_scalar_prefetch=0,
            grid=grid,
            in_specs=[
                pl.BlockSpec((pl.Squeezed(), t, d_k),
                             lambda bi, qi, ki: (bi, qi, 0)),
                pl.BlockSpec((pl.Squeezed(), t, d_k),
                             lambda bi, qi, ki: (bi, ki, 0)),
                pl.BlockSpec((pl.Squeezed(), t, d_v),
                             lambda bi, qi, ki: (bi, ki, 0)),
            ],
            out_specs=pl.BlockSpec((pl.Squeezed(), t, d_v),
                                   lambda bi, qi, ki: (bi, qi, 0)),
            scratch_shapes=[
                pltpu.VMEM((t, 1), jnp.float32),    # running max
                pltpu.VMEM((t, 1), jnp.float32),    # running sum
                pltpu.VMEM((t, d_v), jnp.float32),  # output accumulator
            ]),
        compiler_params=pltpu.CompilerParams(
            dimension_semantics=("parallel", "parallel", "arbitrary"),
            vmem_limit_bytes=48 * 1024 * 1024),
        cost_estimate=pl.CostEstimate(flops=flops,
                                      transcendentals=transcendentals,
                                      bytes_accessed=bytes_accessed),
    )(qp, kp, vp)

    if need_mask:
        out = out[:, :n, :]
    return out


def attention_head(q, k, v, params, *, block=256, mxu_dtype=jnp.bfloat16):
    """q, k, v: (b, n, d_model).  Returns (b, n, d_v).

    params = (wq, bq, wk, bk, wv, bv); weights stored as (d_model, d_out)
    (transpose of PyTorch nn.Linear layout), biases as (1, d_out).
    """
    wq, bq, wk, bk, wv, bv = params
    d_k = wq.shape[1]
    inv_temper = 1.0 / (float(d_k) ** 0.5)

    # Projections once per call, as plain XLA batched matmuls (MXU-optimal);
    # the flash kernel only sees already-projected tensors.  The 1/sqrt(d_k)
    # scale is folded into qp (applied to n*d_k elements, not n^2 scores).
    qp = (jnp.einsum("bnd,dk->bnk", q, wq) + bq) * inv_temper
    kp = jnp.einsum("bnd,dk->bnk", k, wk) + bk
    vp = jnp.einsum("bnd,dk->bnk", v, wv) + bv

    # Run the MXU in bf16 when the caller passes f32 (softmax math stays f32
    # inside the kernel); also halves the kernel's HBM input traffic.
    compute_dtype = q.dtype
    if mxu_dtype is not None and q.dtype == jnp.float32:
        compute_dtype = mxu_dtype
    qp = qp.astype(compute_dtype)
    kp = kp.astype(compute_dtype)
    vp = vp.astype(compute_dtype)

    return _flash_attention(qp, kp, vp, out_dtype=q.dtype, block=block)


def reference_attention_head(q, k, v, params):
    """Plain-JAX f32 reference mirroring the PyTorch forward (mask=None path)."""
    wq, bq, wk, bk, wv, bv = params
    d_k = wq.shape[1]
    qp = q @ wq + bq
    kp = k @ wk + bk
    vp = v @ wv + bv
    attn = jnp.einsum("bnd,bmd->bnm", qp, kp) / (d_k ** 0.5)
    attn = jax.nn.softmax(attn, axis=-1)
    return jnp.einsum("bnm,bmd->bnd", attn, vp)


if __name__ == "__main__":
    # Small shapes consistent with the module's forward.
    B, N, D_MODEL, D_K, D_V = 2, 8, 32, 16, 16

    key = jax.random.PRNGKey(0)
    keys = jax.random.split(key, 9)

    q = jax.random.normal(keys[0], (B, N, D_MODEL), dtype=jnp.float32)
    k = jax.random.normal(keys[1], (B, N, D_MODEL), dtype=jnp.float32)
    v = jax.random.normal(keys[2], (B, N, D_MODEL), dtype=jnp.float32)

    # Deterministic parameter init (shapes from nn.Linear(d_model, d_*)),
    # stored transposed vs PyTorch: (d_model, d_out).
    scale = 1.0 / (D_MODEL ** 0.5)
    wq = jax.random.uniform(keys[3], (D_MODEL, D_K), jnp.float32, -scale, scale)
    bq = jax.random.uniform(keys[4], (1, D_K), jnp.float32, -scale, scale)
    wk = jax.random.uniform(keys[5], (D_MODEL, D_K), jnp.float32, -scale, scale)
    bk = jax.random.uniform(keys[6], (1, D_K), jnp.float32, -scale, scale)
    wv = jax.random.uniform(keys[7], (D_MODEL, D_V), jnp.float32, -scale, scale)
    bv = jax.random.uniform(keys[8], (1, D_V), jnp.float32, -scale, scale)
    params = (wq, bq, wk, bk, wv, bv)

    out = attention_head(q, k, v, params)
    out = jax.block_until_ready(out)

    ref = reference_attention_head(q, k, v, params)
    assert out.shape == (B, N, D_V)
    # Tolerance reflects bf16 MXU operands + approx EUP reciprocal vs the
    # exact f32 reference.
    assert jnp.allclose(out, ref, atol=3e-2, rtol=3e-2), "mismatch vs reference"

    print("KERNEL_OK")
</pallas_src>

<mosaic_0001>
module attributes {stable_mosaic.version = 11 : i64} {
  func.func @_flash_attn_kernel(%arg0: i32, %arg1: i32, %arg2: i32, %arg3: memref<1x8x16xbf16, #tpu.memory_space<vmem>>, %arg4: memref<1x8x16xbf16, #tpu.memory_space<vmem>>, %arg5: memref<1x8x16xbf16, #tpu.memory_space<vmem>>, %arg6: memref<1x8x16xf32, #tpu.memory_space<vmem>>, %arg7: memref<8x1xf32, #tpu.memory_space<vmem>>, %arg8: memref<8x1xf32, #tpu.memory_space<vmem>>, %arg9: memref<8x16xf32, #tpu.memory_space<vmem>>) attributes {dimension_semantics = [#tpu.dimension_semantics<parallel>, #tpu.dimension_semantics<parallel>, #tpu.dimension_semantics<arbitrary>], iteration_bounds = array<i64: 2, 1, 1>, scalar_prefetch = 0 : i64, scratch_operands = 3 : i64, tpu.core_type = #tpu.core_type<tc>, window_params = [{transform_indices = @transform_0, window_bounds = array<i64: 1, 8, 16>}, {transform_indices = @transform_1, window_bounds = array<i64: 1, 8, 16>}, {transform_indices = @transform_2, window_bounds = array<i64: 1, 8, 16>}, {transform_indices = @transform_3, window_bounds = array<i64: 1, 8, 16>}]} {
    %c0_i32 = arith.constant 0 : i32
    %0 = arith.cmpi eq, %arg2, %c0_i32 : i32
    %1 = arith.extui %0 : i1 to i32
    %c0_i32_0 = arith.constant 0 : i32
    %2 = arith.cmpi ne, %1, %c0_i32_0 : i32
    scf.if %2 {
      %cst_26 = arith.constant 0xFF800000 : f32
      %36 = vector.broadcast %cst_26 : f32 to vector<8x1xf32>
      %c0_27 = arith.constant 0 : index
      %c0_28 = arith.constant 0 : index
      %37 = vector.load %arg7[%c0_27, %c0_28] : memref<8x1xf32, #tpu.memory_space<vmem>>, vector<8x1xf32>
      tpu.vector_store %arg7[%c0_27, %c0_28], %36 {strides = array<i32>} : memref<8x1xf32, #tpu.memory_space<vmem>>, vector<8x1xf32>,
      %cst_29 = arith.constant 0.000000e+00 : f32
      %38 = vector.broadcast %cst_29 : f32 to vector<8x1xf32>
      %c0_30 = arith.constant 0 : index
      %c0_31 = arith.constant 0 : index
      %39 = vector.load %arg8[%c0_30, %c0_31] : memref<8x1xf32, #tpu.memory_space<vmem>>, vector<8x1xf32>
      tpu.vector_store %arg8[%c0_30, %c0_31], %38 {strides = array<i32>} : memref<8x1xf32, #tpu.memory_space<vmem>>, vector<8x1xf32>,
      %cst_32 = arith.constant 0.000000e+00 : f32
      %40 = vector.broadcast %cst_32 : f32 to vector<8x16xf32>
      %c0_33 = arith.constant 0 : index
      %c0_34 = arith.constant 0 : index
      %41 = vector.load %arg9[%c0_33, %c0_34] : memref<8x16xf32, #tpu.memory_space<vmem>>, vector<8x16xf32>
      tpu.vector_store %arg9[%c0_33, %c0_34], %40 {strides = array<i32>} : memref<8x16xf32, #tpu.memory_space<vmem>>, vector<8x16xf32>,
    } else {
    }
    %c0 = arith.constant 0 : index
    %c0_1 = arith.constant 0 : index
    %c0_2 = arith.constant 0 : index
    %3 = vector.load %arg3[%c0, %c0_1, %c0_2] : memref<1x8x16xbf16, #tpu.memory_space<vmem>>, vector<1x8x16xbf16>
    %4 = vector.shape_cast %3 : vector<1x8x16xbf16> to vector<8x16xbf16>
    %c0_3 = arith.constant 0 : index
    %c0_4 = arith.constant 0 : index
    %c0_5 = arith.constant 0 : index
    %5 = vector.load %arg4[%c0_3, %c0_4, %c0_5] : memref<1x8x16xbf16, #tpu.memory_space<vmem>>, vector<1x8x16xbf16>
    %6 = vector.shape_cast %5 : vector<1x8x16xbf16> to vector<8x16xbf16>
    %cst = arith.constant dense<0.000000e+00> : vector<8x8xf32>
    %7 = tpu.matmul %4, %6, %cst {dimension_numbers = #tpu.dot_dimension_numbers<[1], [1], [0], [0], [0, 0, 1, 0], [], []>} : vector<8x16xbf16>, vector<8x16xbf16>, vector<8x8xf32> -> vector<8x8xf32>
    %c0_6 = arith.constant 0 : index
    %c0_7 = arith.constant 0 : index
    %8 = vector.load %arg7[%c0_6, %c0_7] : memref<8x1xf32, #tpu.memory_space<vmem>>, vector<8x1xf32>
    %cst_8 = arith.constant dense<0xFF800000> : vector<8xf32>
    %9 = vector.multi_reduction <maximumf>, %7, %cst_8 [1] : vector<8x8xf32> to vector<8xf32>
    %10 = vector.shape_cast %9 : vector<8xf32> to vector<8x1xf32>
    %11 = arith.maximumf %8, %10 : vector<8x1xf32>
    %12 = arith.subf %8, %11 : vector<8x1xf32>
    %13 = math.exp %12 : vector<8x1xf32>
    %14 = vector.broadcast %11 : vector<8x1xf32> to vector<8x8xf32>
    %15 = arith.subf %7, %14 : vector<8x8xf32>
    %16 = math.exp %15 : vector<8x8xf32>
    %c0_9 = arith.constant 0 : index
    %c0_10 = arith.constant 0 : index
    %17 = vector.load %arg8[%c0_9, %c0_10] : memref<8x1xf32, #tpu.memory_space<vmem>>, vector<8x1xf32>
    %18 = arith.mulf %13, %17 : vector<8x1xf32>
    %cst_11 = arith.constant dense<0.000000e+00> : vector<8xf32>
    %19 = vector.multi_reduction <add>, %16, %cst_11 [1] : vector<8x8xf32> to vector<8xf32>
    %20 = vector.shape_cast %19 : vector<8xf32> to vector<8x1xf32>
    %21 = arith.addf %18, %20 : vector<8x1xf32>
    %c0_12 = arith.constant 0 : index
    %c0_13 = arith.constant 0 : index
    %22 = vector.load %arg8[%c0_12, %c0_13] : memref<8x1xf32, #tpu.memory_space<vmem>>, vector<8x1xf32>
    tpu.vector_store %arg8[%c0_12, %c0_13], %21 {strides = array<i32>} : memref<8x1xf32, #tpu.memory_space<vmem>>, vector<8x1xf32>,
    %c0_14 = arith.constant 0 : index
    %c0_15 = arith.constant 0 : index
    %23 = vector.load %arg9[%c0_14, %c0_15] : memref<8x16xf32, #tpu.memory_space<vmem>>, vector<8x16xf32>
    %24 = vector.broadcast %13 : vector<8x1xf32> to vector<8x16xf32>
    %25 = arith.mulf %24, %23 : vector<8x16xf32>
    %26 = arith.truncf %16 : vector<8x8xf32> to vector<8x8xbf16>
    %c0_16 = arith.constant 0 : index
    %c0_17 = arith.constant 0 : index
    %c0_18 = arith.constant 0 : index
    %27 = vector.load %arg5[%c0_16, %c0_17, %c0_18] : memref<1x8x16xbf16, #tpu.memory_space<vmem>>, vector<1x8x16xbf16>
    %28 = vector.shape_cast %27 : vector<1x8x16xbf16> to vector<8x16xbf16>
    %cst_19 = arith.constant dense<0.000000e+00> : vector<8x16xf32>
    %29 = tpu.matmul %26, %28, %cst_19 {dimension_numbers = #tpu.dot_dimension_numbers<[1], [0], [0], [1], [0, 0, 1, 1], [], []>} : vector<8x8xbf16>, vector<8x16xbf16>, vector<8x16xf32> -> vector<8x16xf32>
    %30 = arith.addf %25, %29 : vector<8x16xf32>
    %c0_20 = arith.constant 0 : index
    %c0_21 = arith.constant 0 : index
    %31 = vector.load %arg9[%c0_20, %c0_21] : memref<8x16xf32, #tpu.memory_space<vmem>>, vector<8x16xf32>
    tpu.vector_store %arg9[%c0_20, %c0_21], %30 {strides = array<i32>} : memref<8x16xf32, #tpu.memory_space<vmem>>, vector<8x16xf32>,
    %c0_22 = arith.constant 0 : index
    %c0_23 = arith.constant 0 : index
    %32 = vector.load %arg7[%c0_22, %c0_23] : memref<8x1xf32, #tpu.memory_space<vmem>>, vector<8x1xf32>
    tpu.vector_store %arg7[%c0_22, %c0_23], %11 {strides = array<i32>} : memref<8x1xf32, #tpu.memory_space<vmem>>, vector<8x1xf32>,
    %c0_i32_24 = arith.constant 0 : i32
    %33 = arith.cmpi eq, %arg2, %c0_i32_24 : i32
    %34 = arith.extui %33 : i1 to i32
    %c0_i32_25 = arith.constant 0 : i32
    %35 = arith.cmpi ne, %34, %c0_i32_25 : i32
    scf.if %35 {
      %c0_26 = arith.constant 0 : index
      %c0_27 = arith.constant 0 : index
      %36 = vector.load %arg8[%c0_26, %c0_27] : memref<8x1xf32, #tpu.memory_space<vmem>>, vector<8x1xf32>
      %37 = tpu.reciprocal %36 {approx = true} : vector<8x1xf32> -> vector<8x1xf32>
      %c0_28 = arith.constant 0 : index
      %c0_29 = arith.constant 0 : index
      %38 = vector.load %arg9[%c0_28, %c0_29] : memref<8x16xf32, #tpu.memory_space<vmem>>, vector<8x16xf32>
      %39 = vector.broadcast %37 : vector<8x1xf32> to vector<8x16xf32>
      %40 = arith.mulf %38, %39 : vector<8x16xf32>
      %c0_30 = arith.constant 0 : index
      %c0_31 = arith.constant 0 : index
      %c0_32 = arith.constant 0 : index
      %41 = vector.load %arg6[%c0_30, %c0_31, %c0_32] : memref<1x8x16xf32, #tpu.memory_space<vmem>>, vector<1x8x16xf32>
      %42 = vector.shape_cast %41 : vector<1x8x16xf32> to vector<8x16xf32>
      %43 = vector.shape_cast %40 : vector<8x16xf32> to vector<1x8x16xf32>
      tpu.vector_store %arg6[%c0_30, %c0_31, %c0_32], %43 {strides = array<i32>} : memref<1x8x16xf32, #tpu.memory_space<vmem>>, vector<1x8x16xf32>,
    } else {
    }
    return
  }
  func.func @transform_0(%arg0: i32, %arg1: i32, %arg2: i32) -> (i32, i32, i32) {
    %c0_i32 = arith.constant 0 : i32
    %c0_i32_0 = arith.constant 0 : i32
    return %arg0, %arg1, %c0_i32 : i32, i32, i32
  }
  func.func @transform_1(%arg0: i32, %arg1: i32, %arg2: i32) -> (i32, i32, i32) {
    %c0_i32 = arith.constant 0 : i32
    %c0_i32_0 = arith.constant 0 : i32
    return %arg0, %arg2, %c0_i32 : i32, i32, i32
  }
  func.func @transform_2(%arg0: i32, %arg1: i32, %arg2: i32) -> (i32, i32, i32) {
    %c0_i32 = arith.constant 0 : i32
    %c0_i32_0 = arith.constant 0 : i32
    return %arg0, %arg2, %c0_i32 : i32, i32, i32
  }
  func.func @transform_3(%arg0: i32, %arg1: i32, %arg2: i32) -> (i32, i32, i32) {
    %c0_i32 = arith.constant 0 : i32
    %c0_i32_0 = arith.constant 0 : i32
    return %arg0, %arg1, %c0_i32 : i32, i32, i32
  }
}

</mosaic_0001>

<bundles_post_ra>
// kernel: tpu_custom_call.1
= control target key start
LH: loop header
LB: loop body
LE: loop exit
PB: predicated region body
PF: predicated region fallthrough
CT: control target
= control target key end

     0   :  { %s1016_s0 = inlined_call_operand.hbm [shape: bf16[2,8,16], index: 0, kind: input, shape index: {}]   ;;  %s1017_s1 = inlined_call_operand.hbm [shape: bf16[2,8,16], index: 1, kind: input, shape index: {}]   ;;  %s1018_s2 = inlined_call_operand.hbm [shape: bf16[2,8,16], index: 2, kind: input, shape index: {}]   ;;  %s1019_s3 = inlined_call_operand.hbm [shape: f32[2,8,16], index: 3, kind: output, shape index: {}]  }
   0x1   :  { %1022 = sst [smem:[#allocation18_spill]] %s1017_s1 }
   0x2   :  { %8 = vsyncpa [#allocation6], 0 }
   0x3   :  { %10 = vsyncpa [#allocation6 + $0x1], 0 }
   0x4   :  { %11 = vsyncpa [#allocation9], 0 }
   0x5   :  { %13 = vsyncpa [#allocation9 + $0x1], 0 }
   0x6   :  { %14 = vsyncpa [#allocation7], 0 }
   0x7   :  { %16 = vsyncpa [#allocation7 + $0x1], 0  ;;  %s846_s12 = smov 0   ;;  %s848_s13 = smov 0  }
   0x8   :  { %s850_s14 = smov 0   ;;  %s852_s15 = smov 0  }
   0x9   :  { %s854_s16 = smov 0   ;;  %s856_s17 = smov 0  }
   0xa LB: > { %1023 = sst [smem:[#allocation15_spill]] %s817_s16  ;;  %s877_s18 = sadd.s32 4294967295, %s821_s17   ;;  %s821_s17 = sphi %s856_s17, %s22_s17   ;;  %s817_s16 = sphi %s854_s16, %s1039_s16   ;;  %s813_s15 = sphi %s852_s15, %s1034_s15   ;;  %s809_s14 = sphi %s850_s14, %s1038_s14   ;;  %s805_s13 = sphi %s848_s13, %s1037_s13   ;;  %s801_s12 = sphi %s846_s12, %s1036_s12  }
   0xb   : > { %s541_s19 = sadd.s32 4294967294, %s821_s17   ;;  %s41_s20 = sadd.s32 1, %s817_s16 }
   0xc   : > { %s50_s21 = sadd.s32 1, %s809_s14  ;;  %p43_p0 = scmp.ge.s32.totalorder %s41_s20, 2 }
   0xd   : > { %p57_p1 = scmp.ne.s32.totalorder %s809_s14, %s805_s13  ;;  %p58_p2 = scmp.eq.s32.totalorder %s821_s17, 0 }
   0xe   : > { %p63_p3 = scmp.ne.s32.totalorder %s805_s13, %s801_s12  ;;  %s1041_s20 = smov (%p43_p0, %s41_s20), 0 }
   0xf   : > { %1024 = sst [smem:[#allocation16_spill]] %s1041_s20  ;;  %p889_p4 = por %p58_p2, %p57_p1 }
  0x10   : > { %p64_p5 = scmp.eq.s32.totalorder %s877_s18, 0  ;;  %s45_s23 = ssub.s32 %s817_s16, %s1041_s20 }
  0x11   : > { %p145_p6 = scmp.eq.s32.totalorder %s877_s18, 1  ;;  %p48_p7 = scmp.eq.s32.totalorder %s45_s23, 0 }
  0x12   : > { %p897_p8 = por %p64_p5, %p63_p3  ;;  %p151_p10 = scmp.eq.s32.totalorder %s541_s19, 1 }
  0x13   : > { %p901_p9 = por %p145_p6, %p57_p1  ;;  %p543_p12 = scmp.ge.s32.totalorder %s821_s17, 2 }
  0x14   : > { %s906_s26 = scalar_select %p48_p7, %s809_s14, %s50_s21  }
  0x15   : > { %p908_p11 = por %p151_p10, %p63_p3  ;;  %p583_p13 = scmp.lt.s32.totalorder %s821_s17, 2 }
  0x16   : > { %1028 = sst [smem:[#allocation17_spill]] %s906_s26  ;;  %s171_s28 = sand.u32 1, %s809_s14  }
  0x17   : > { %s544_s29 = sshll.u32 %s171_s28, 2  ;;  %s545_s30 = sshll.u32 %s817_s16, 2 }
  0x18   : > { %p918_p0 = pnand %p583_p13, %p889_p4  ;;  %s191_s5 = sand.u32 1, %s821_s17  }
  0x19   : > { %s1031_s1 = sld [smem:[#allocation18_spill]]  ;;  %s195_s10 = scalar_lea.vmem [#allocation8], %s544_s29 }
  0x1a   : > { %s204_s11 = sshll.u32 %s195_s10, 4  ;;  %s192_s19 = scalar_lea.sflag [#allocation9], %s191_s5  ;;  %s205_s11 = int_to_ptr.vmem [resolvable:$true] %s204_s11 }
  0x1b   : > { %p550_p1 = scmp.ge.s32.totalorder %s821_s17, 1  ;;  %p229_p2 = scmp.lt.s32.totalorder %s821_s17, 3 }
  0x1c   : > { %s180_s6 = scalar_lea.hbm %s1016_s0, %s545_s30  ;;  %s172_s10 = scalar_lea.sflag [#allocation6], %s171_s28 }
  0x1d   : > { %p930_p3 = pnand %p550_p1, %p229_p2  ;;  %s182_s7 = sshll.u32 %s180_s6, 4  ;;  %s183_s7 = int_to_ptr.hbm [resolvable:$true] %s182_s7 }
  0x1e   : > { %s215_s16 = scalar_lea.vmem [#allocation10], %s544_s29  ;;  %s947_s22 = sand.u32 (!%p930_p3), 1, %s805_s13  }
  0x1f   : > { %s200_s8 = scalar_lea.hbm %s1031_s1, %s545_s30  ;;  %s224_s26 = sshll.u32 %s215_s16, 4  ;;  %s225_s26 = int_to_ptr.vmem [resolvable:$true] %s224_s26 }
  0x20   : > { %s202_s9 = sshll.u32 %s200_s8, 4  ;;  %s175_s8 = scalar_lea.vmem [#allocation5], %s544_s29  ;;  %s203_s9 = int_to_ptr.hbm [resolvable:$true] %s202_s9 }
  0x21   : > { %575 = dma.hbm_to_vmem [thread:$0]  (!%p918_p0), %s203_s9, 64, %s205_s11, %s192_s19  }
  0x22   : > { %s184_s1 = sshll.u32 %s175_s8, 4  ;;  %s220_s11 = scalar_lea.hbm %s1018_s2, %s545_s30  ;;  %s185_s1 = int_to_ptr.vmem [resolvable:$true] %s184_s1 }
  0x23   : > { %572 = dma.hbm_to_vmem [thread:$0]  (!%p918_p0), %s183_s7, 64, %s185_s1, %s172_s10  }
  0x24   : > { %s222_s20 = sshll.u32 %s220_s11, 4  ;;  %233 = sbr.rel (%p930_p3) target bundleno = 655 (0x28f), region = 32  ;;  %s223_s20 = int_to_ptr.hbm [resolvable:$true] %s222_s20 }
  0x25   : > { %578 = dma.hbm_to_vmem [thread:$0]  (!%p918_p0), %s223_s20, 64, %s225_s26, %s192_s19  }
  0x26   : > { %s950_s1 = sshll.u32 (!%p930_p3), %s947_s22, 2  ;;  %s236_s28 = scalar_lea.sflag (!%p930_p3), [#allocation6], %s947_s22 }
  0x27   : > { %s239_s30 = scalar_lea.vmem (!%p930_p3), [#allocation5], %s950_s1 }
  0x29   : > { %788 = dma.done.wait (%p897_p8), %s236_s28, 64  }
  0x2a   : > { %790 = vsyncadd (%p897_p8), %s236_s28, 4294967232  ;;  %s245_s16 = sand.u32 1, %s877_s18   ;;  %s249_s26 = scalar_lea.vmem [#allocation8], %s950_s1 }
  0x2b   : > { %s246_s20 = scalar_lea.sflag [#allocation9], %s245_s16 }
  0x2c   : > { %792 = dma.done.wait (%p897_p8), %s246_s20, 128  }
  0x2d   : > { %794 = vsyncadd (%p897_p8), %s246_s20, 4294967168  ;;  %vm301_vm0 = vcmask 130048   ;;  %v823_v0 = vmov 0.0   ;;  %v304_v1 = vld [vmem:[%s249_s26] sm:$0xf]  ;;  %vm298_vm1 = vcmask 7168  }
  0x2e   : > { %302 = vst.msk [vmem:[#allocation4] sm:$0xff] %vm301_vm0, %v823_v0  ;;  %v310_v2 = vsel %vm301_vm0, %v304_v1, 0  ;;  %v303_v3 = vld [vmem:[%s239_s30] sm:$0xf]  ;;  %v824_v4 = vmov -inf   ;;  %vm326_vm2 = vcmask 64512  }
  0x2f   : > { %319 = vmatpush.bf16.xpose.msra.mxu0 %v310_v2  ;;  %299 = vst.msk [vmem:[#allocation2] sm:$0xff] %vm298_vm1, %v824_v4  ;;  %v825_v8 = vmov 0   ;;  %s259_s18 = scalar_lea.vmem [#allocation10], %s950_s1  ;;  %vm362_vm3 = vcmask 1043456   ;;  %s554_s24 = sshll.u32 %s947_s22, 3 }
  0x30   : > { %300 = vst.msk [vmem:[#allocation3] sm:$0xff] %vm298_vm1, %v823_v0  ;;  %636 = vset.pattern.permute.xlu0 %v825_v8  ;;  %637 = vset.pattern.permute.xlu1 %v825_v8  ;;  %v358_v13 = vld [vmem:[%s259_s18] sm:$0xf]  ;;  %s558_s29 = sshll.u32 %s813_s15, 3  ;;  %s292_s23 = scalar_lea.vmem [#allocation11], %s554_s24 }
  0x31   : > { %638 = vset.pattern.permute.xlu2 %v825_v8  ;;  %v364_v14 = vsel %vm362_vm3, %v358_v13, 0  ;;  %s407_s21 = scalar_lea.hbm %s1019_s3, %s558_s29  ;;  %s409_s6 = sshll.u32 %s292_s23, 4  ;;  %s410_s6 = int_to_ptr.vmem [resolvable:$true] %s409_s6 }
  0x32   : > { %373 = vmatpush.bf16.msra.mxu1 %v364_v14  ;;  %s411_s7 = sshll.u32 %s407_s21, 4  ;;  %s396_s8 = scalar_lea.sflag [#allocation7], %s947_s22  ;;  %s412_s7 = int_to_ptr.hbm [resolvable:$true] %s411_s7 }
  0x33   : > { %s749_s10 = sshra.s32 %s412_s7, 4  ;;  %s755_s11 = scalar_lea.hbm %s1019_s3, 16  ;;  %s750_s10 = int_to_ptr.hbm [resolvable:$true] %s749_s10 }
  0x34   : > { %s751_s5 = scalar_lea.hbm %s750_s10, 8  ;;  %p756_p7 = scmp.lt.s32.totalorder %s750_s10, %s1019_s3 }
  0x35   : > { %v350_v31 = vld [vmem:[#allocation4] sm:$0xff]  ;;  %p752_p4 = scmp.ne.s32.totalorder %s750_s10, %s751_s5  ;;  %p757_p8 = scmp.lt.s32.totalorder %s755_s11, %s751_s5 }
  0x36   : > { %555 = vmatmul.msk.bf16.vlgmr.msra.gmra.mxu0 %vm301_vm0, %v303_v3  ;;  %v325_v9 = vld [vmem:[#allocation2] sm:$0xff] }
  0x37   : > { %v342_v23 = vld [vmem:[#allocation3] sm:$0xff]  ;;  %p753_p5 = pnand %p752_p4, %p901_p9  ;;  %p758_p10 = por %p757_p8, %p756_p7 }
  0x39   : > { %p754_p6 = pneg %p753_p5 }
  0x3b   : > { %p759_p13 = pnand %p758_p10, %p754_p6 }
  0xb3   : > { %v321_v5 = vpop.f32.mrf.mxu0 }
  0xb4   : > { %v327_v6 = vsel %vm326_vm2, %v321_v5, -inf }
  0xb5   : > { %328 = vmax.xlane.f32.xlu0 %v327_v6 }
  0xbb   : > { %v323_v7 = vpop.f32.mrf.mxu0 }
 0x128   : > { %v329_v10 = vpop.xlane.xlu0 %328 }
 0x129   : > { %v330_v11 = vmax.f32 %v325_v9, %v329_v10 }
 0x12b   : > { %v331_v12 = vsub.f32 %v325_v9, %v330_v11  ;;  %381 = vst.msk [vmem:[#allocation2] sm:$0xff] %vm298_vm1, %v330_v11  ;;  %336 = vperm.xlu0 %636, %v330_v11  }
 0x12d   : > { %v332_v21 = vmul.f32 1.442695, %v331_v12 }
 0x19d   : > { %v337_v15 = vpop.permute.xlu0 %336 }
 0x19e   : > { %v339_v16 = vsub.f32 %v321_v5, %v337_v15 }
 0x1a0   : > { %v340_v17 = vmul.f32 1.442695, %v339_v16 }
 0x1a2   : > { %639 = vpow2.f32 %v340_v17 }
 0x1a3   : > { %641 = vpow2.f32 %v332_v21 }
 0x1a8   : > { %v640_v18 = vpop.eup %639 }
 0x1a9   : > { %v344_v19 = vsel %vm326_vm2, %v640_v18, 0.0  ;;  %v357_v20 = vpack.c.bf16 %v640_v18, %v640_v18  ;;  %v642_v22 = vpop.eup %641 }
 0x1aa   : > { %345 = vadd.xlane.f32.xlu1 %v344_v19  ;;  %v343_v24 = vmul.f32 %v642_v22, %v342_v23 }
 0x1ab   : > { %556 = vmatmul.msk.bf16.vlgmr.msra.gmra.mxu1 %vm326_vm2, %v357_v20 }
 0x1c3   : > { %353 = vperm.xlu1 %637, %v642_v22  }
 0x21d   : > { %v346_v25 = vpop.xlane.xlu1 %345 }
 0x21e   : > { %v347_v26 = vadd.f32 %v346_v25, %v343_v24 }
 0x220   : > { %349 = vst.msk [vmem:[#allocation3] sm:$0xff] %vm298_vm1, %v347_v26 }
 0x227   : > { %v385_v27 = vld [vmem:[#allocation3] sm:$0xff] }
 0x228   : > { %v375_v28 = vpop.f32.mrf.mxu1  ;;  %643 = vrcp.f32 %v385_v27 }
 0x22e   : > { %v644_v29 = vpop.eup %643 }
 0x22f   : > { %390 = vperm.xlu2 %638, %v644_v29  }
 0x230   : > { %v377_v30 = vpop.f32.mrf.mxu1 }
 0x235   : > { %v354_v32 = vpop.permute.xlu1 %353 }
 0x236   : > { %v356_v33 = vmul.f32 %v354_v32, %v350_v31 }
 0x238   : > { %v379_v34 = vadd.f32 %v375_v28, %v356_v33 }
 0x23a   : > { %380 = vst.msk [vmem:[#allocation4] sm:$0xff] %vm301_vm0, %v379_v34 }
 0x241   : > { %v387_v35 = vld [vmem:[#allocation4] sm:$0xff] }
 0x289   : > { %v391_v36 = vpop.permute.xlu2 %390 }
 0x28a   : > { %v393_v37 = vmul.f32 %v391_v36, %v387_v35 }
 0x28c   : > { %394 = vst.msk [vmem:[%s292_s23] sm:$0xff] %vm301_vm0, %v393_v37 }
 0x28d   : > { %762 = shalt.err (!%p759_p13)
}
 0x28e   : > { %567 = dma.vmem_to_hbm [thread:$0]  (%p901_p9), %s410_s6, 128, %s412_s7, %s396_s8  }
 0x28f PF: > { %s423_s22 = sand.u32 1, %s801_s12   ;;  %p580_p0 = pnand %p543_p12, %p908_p11 }
 0x290   : > { %s424_s30 = scalar_lea.sflag [#allocation7], %s423_s22 }
 0x291   : > { %p581_p1 = pneg %p580_p0 }
 0x293   : > { %796 = dma.done.wait (%p581_p1), %s424_s30, 128  }
 0x294   : > { %798 = vsyncadd (%p581_p1), %s424_s30, 4294967168  ;;  %s22_s17 = sadd.s32 1, %s821_s17   ;;  %s1033_s16 = sld [smem:[#allocation17_spill]] }
 0x295   : > { %p19_p2 = scmp.ge.s32.totalorder %s22_s17, 4   ;;  %s1034_s15 = sld [smem:[#allocation15_spill]] }
 0x296   : > { %s1035_s25 = sld [smem:[#allocation16_spill]]  ;;  %s1036_s12 = smov %s805_s13 }
 0x297   : > { %s1037_s13 = smov %s809_s14 }
 0x298   :  { %21 = sbr.rel (!%p19_p2) target bundleno = 10 (0xa), region = 109 }
 0x29a   : > { %s1038_s14 = smov %s1033_s16 }
 0x29c   : > { %s1039_s16 = smov %s1035_s25 }
 0x29d   :  { %430 = vsyncpa [#allocation6], 1 }
 0x29e   :  { %432 = vsyncpa [#allocation6 + $0x1], 1 }
 0x29f   :  { %433 = vsyncpa [#allocation9], 1 }
 0x2a0   :  { %435 = vsyncpa [#allocation9 + $0x1], 1 }
 0x2a1   :  { %436 = vsyncpa [#allocation7], 1 }
 0x2a2   :  { %438 = vsyncpa [#allocation7 + $0x1], 1 }

</bundles_post_ra>
